<compile_context>
chip_gen: v7x
topology: tpu7x:2x2x1
jax: 0.10.0
libtpu: 0.0.40
codegen_flags: <defaults>
</compile_context>

<pallas_src>
import functools

import jax
import jax.numpy as jnp
from jax import lax
from jax.experimental import pallas as pl
from jax.experimental.pallas import tpu as pltpu

_HIGHEST = jax.lax.Precision.HIGHEST


def _multibox_tile_kernel(obj_ref, gath_ref, pri_ref, locs_ref, scores_ref,
                          out_ref, *, threshold, n_priors, tile_p):
    # obj_ref    : (1, NOBJ, 8)  cols [x1 y1 x2 y2 label best_prior valid filt_idx]
    # gath_ref   : (1, 8, NOBJ)  rows [label x1 y1 x2 y2 0 0 0]
    # pri_ref    : (8, P_pad)    rows [px1 py1 px2 py2 pcx pcy pw ph]  (resident)
    # locs_ref   : (1, 4, T)     lane-dense, native dtype
    # scores_ref : (1, C, T)     lane-dense, native dtype
    # out_ref    : (1, 3, T)     rows [cross_entropy, positive_mask, smooth_l1]
    NOBJ = obj_ref.shape[1]
    C = scores_ref.shape[1]
    T = tile_p

    # global prior index of each lane of this tile, and validity (un-padded).
    lane = lax.broadcasted_iota(jnp.int32, (1, T), 1)
    p_global = (lane + pl.program_id(1) * T).astype(jnp.float32)          # (1, T)
    valid = p_global < float(n_priors)                                    # (1, T)

    om = obj_ref[0]                                                       # (NOBJ, 8)
    bx1, by1 = om[:, 0:1], om[:, 1:2]
    bx2, by2 = om[:, 2:3], om[:, 3:4]
    prior_for_obj = om[:, 5:6]                                            # (NOBJ, 1)
    obj_valid = om[:, 6:7]                                                # (NOBJ, 1)
    filt_idx = om[:, 7:8]                                                 # (NOBJ, 1)

    # priors: resident block, slice the current tile (128-aligned start).
    if pri_ref.shape[1] == T:
        pri = pri_ref[...]                                                # (8, T)
    else:
        p0 = pl.multiple_of(pl.program_id(1) * T, T)
        pri = pri_ref[:, pl.ds(p0, T)]                                    # (8, T)
    px1, py1, px2, py2 = pri[0:1], pri[1:2], pri[2:3], pri[3:4]
    pcx, pcy, pw, ph = pri[4:5], pri[5:6], pri[6:7], pri[7:8]

    # ---- Jaccard overlap, (NOBJ, T), prior axis on lanes ----
    # TODO(synk): for NOBJ >= 32 this section should become a chunked
    # fori_loop(unroll=True) with running max accumulators to avoid spills.
    iw = jnp.maximum(jnp.minimum(bx2, px2) - jnp.maximum(bx1, px1), 0.0)
    ih = jnp.maximum(jnp.minimum(by2, py2) - jnp.maximum(by1, py1), 0.0)
    inter = iw * ih
    area_b = (bx2 - bx1) * (by2 - by1)
    area_p = (px2 - px1) * (py2 - py1)
    overlap = inter / (area_b + area_p - inter)

    obj_iota = lax.broadcasted_iota(jnp.int32, (NOBJ, T), 0).astype(jnp.float32)

    # best object for each prior (first occurrence on ties)
    ov_for_prior = jnp.max(overlap, axis=0, keepdims=True)                # (1, T)
    obj_for_prior = jnp.min(
        jnp.where(overlap == ov_for_prior, obj_iota, float(NOBJ)),
        axis=0, keepdims=True)                                            # (1, T)

    # Force-match each object's best prior.  Faithful to the reference loop,
    # including its quirk of assigning the object's position in the
    # overlap>0-filtered list and later gathering from the UNfiltered arrays.
    # Single max-reduce: f_assign >= 0 <=> this prior is some object's best.
    match = jnp.logical_and(p_global == prior_for_obj, obj_valid > 0.0)   # (NOBJ, T)
    f_assign = jnp.max(jnp.where(match, filt_idx, -1.0),
                       axis=0, keepdims=True)                             # (1, T)
    forced = f_assign >= 0.0
    obj_assign = jnp.where(forced, f_assign, obj_for_prior)               # (1, T)
    ov_final = jnp.where(forced, 1.0, ov_for_prior)                       # (1, T)
    keep = ov_final >= threshold                                          # (1, T)

    # ---- gather matched [label, x1, y1, x2, y2] with one small MXU matmul ----
    onehot = (obj_iota == obj_assign).astype(jnp.float32)                 # (NOBJ, T)
    gathered = jnp.dot(gath_ref[0], onehot, precision=_HIGHEST,
                       preferred_element_type=jnp.float32)                # (8, T)
    label_raw = gathered[0:1]
    tb_x1, tb_y1 = gathered[1:2], gathered[2:3]
    tb_x2, tb_y2 = gathered[3:4], gathered[4:5]

    label_final = jnp.where(keep, label_raw, 0.0)                         # (1, T)
    pos = jnp.where(jnp.logical_and(label_final > 0.5, valid), 1.0, 0.0)  # (1, T)
    is_pos = pos > 0.5

    # predicted locs / scores: already lane-dense; just upcast after the DMA.
    locs = locs_ref[0].astype(jnp.float32)                                # (4, T)
    s = scores_ref[0].astype(jnp.float32)                                 # (C, T)

    # ---- encode matched boxes: xy -> cxcy -> gcxgcy (variances 0.1 / 0.2) ----
    cx = (tb_x1 + tb_x2) * 0.5
    cy = (tb_y1 + tb_y2) * 0.5
    w = tb_x2 - tb_x1
    h = tb_y2 - tb_y1
    # Guard the log for non-positive priors; their loc loss is masked anyway.
    w = jnp.where(is_pos, w, pw)
    h = jnp.where(is_pos, h, ph)
    g_cx = (cx - pcx) * 10.0 / pw
    g_cy = (cy - pcy) * 10.0 / ph
    g_w = jnp.log(w / pw) * 5.0
    g_h = jnp.log(h / ph) * 5.0

    def smooth_l1(d):
        a = jnp.abs(d)
        return jnp.where(a < 1.0, 0.5 * d * d, a - 0.5)

    d0 = jnp.where(is_pos, locs[0:1] - g_cx, 0.0)
    d1 = jnp.where(is_pos, locs[1:2] - g_cy, 0.0)
    d2 = jnp.where(is_pos, locs[2:3] - g_w, 0.0)
    d3 = jnp.where(is_pos, locs[3:4] - g_h, 0.0)
    sl1 = smooth_l1(d0) + smooth_l1(d1) + smooth_l1(d2) + smooth_l1(d3)   # (1, T)

    # ---- per-prior cross entropy: logsumexp(scores) - scores[target] ----
    m = jnp.max(s, axis=0, keepdims=True)                                 # (1, T)
    lse = m + jnp.log(jnp.sum(jnp.exp(s - m), axis=0, keepdims=True))
    cls_iota = lax.broadcasted_iota(jnp.int32, (C, T), 0).astype(jnp.float32)
    onehot_c = (jnp.abs(cls_iota - label_final) < 0.5).astype(jnp.float32)
    s_t = jnp.sum(s * onehot_c, axis=0, keepdims=True)
    ce = jnp.where(valid, lse - s_t, 0.0)                                 # (1, T)

    # pack [ce, pos, sl1] as 3 sublane rows of one lane-dense block.
    out_ref[...] = jnp.concatenate([ce, pos, sl1], axis=0)[None]          # (1, 3, T)


def _best_prior_per_object(boxes, priors_xy):
    """Best (max-IoU) prior for every ground-truth object — the only reduction
    over the full prior axis, so it stays a tiny plain-JAX pre-pass whose
    (N, NOBJ) result is handed to the Pallas kernel as per-image metadata."""
    bx1, by1 = boxes[..., 0:1], boxes[..., 1:2]
    bx2, by2 = boxes[..., 2:3], boxes[..., 3:4]                 # (N, NOBJ, 1)
    px1 = priors_xy[:, 0][None, None, :]
    py1 = priors_xy[:, 1][None, None, :]
    px2 = priors_xy[:, 2][None, None, :]
    py2 = priors_xy[:, 3][None, None, :]                        # (1, 1, P)
    iw = jnp.maximum(jnp.minimum(bx2, px2) - jnp.maximum(bx1, px1), 0.0)
    ih = jnp.maximum(jnp.minimum(by2, py2) - jnp.maximum(by1, py1), 0.0)
    inter = iw * ih
    area_b = (bx2 - bx1) * (by2 - by1)
    area_p = (px2 - px1) * (py2 - py1)
    overlap = inter / (area_b + area_p - inter)                 # (N, NOBJ, P)
    return jnp.max(overlap, axis=-1), jnp.argmax(overlap, axis=-1)


def multibox_loss_512(predicted_locs, predicted_scores, boxes, labels,
                      priors_cxcy, *, threshold=0.5, neg_pos_ratio=3,
                      alpha=1.0, tile_p=2048, max_pos_per_image=64):
    # TODO(synk): the PyTorch module takes variable-length per-image box/label
    # lists; here they are fixed-size (N, NOBJ) tensors (pad with zero-area
    # boxes / label 0, which the matching treats exactly like the reference).
    N, P, _ = predicted_locs.shape
    C = predicted_scores.shape[2]
    NOBJ = boxes.shape[1]

    # Small tensors only are upcast; the big tensors keep their native dtype.
    boxes = boxes.astype(jnp.float32)
    labels_f = labels.astype(jnp.float32)
    priors_cxcy = priors_cxcy.astype(jnp.float32)

    priors_xy = jnp.concatenate(
        [priors_cxcy[:, :2] - priors_cxcy[:, 2:] / 2.0,
         priors_cxcy[:, :2] + priors_cxcy[:, 2:] / 2.0], axis=1)          # (P, 4)

    # ---- prior-axis tiling ----
    tile_p = max(8, min(int(tile_p), P))
    if P >= 128:
        tile_p = max(128, (tile_p // 128) * 128)
    n_tiles = (P + tile_p - 1) // tile_p
    p_pad = n_tiles * tile_p

    # ---- tiny pre-pass: best prior per object (fed to the kernel) ----
    ov_best, prior_best = _best_prior_per_object(boxes, priors_xy)        # (N, NOBJ)
    obj_valid = (ov_best > 0.0).astype(jnp.float32)                       # (N, NOBJ)
    filt_idx = jnp.cumsum(obj_valid, axis=1) - 1.0                        # (N, NOBJ)

    obj_meta = jnp.concatenate(
        [boxes,
         labels_f[..., None],
         prior_best.astype(jnp.float32)[..., None],
         obj_valid[..., None],
         filt_idx[..., None]], axis=-1)                                   # (N, NOBJ, 8)

    gath = jnp.concatenate(
        [labels_f[:, None, :],
         jnp.transpose(boxes, (0, 2, 1)),
         jnp.zeros((N, 3, NOBJ), jnp.float32)], axis=1)                   # (N, 8, NOBJ)

    pri_pack = jnp.concatenate([priors_xy, priors_cxcy], axis=1).T        # (8, P)
    if p_pad != P:
        # padded priors: tiny boxes far outside the image -> can never match.
        pad_col = jnp.array([-4.0, -4.0, -3.99, -3.99, -3.995, -3.995,
                             0.01, 0.01], jnp.float32)[:, None]
        pri_pack = jnp.concatenate(
            [pri_pack, jnp.tile(pad_col, (1, p_pad - P))], axis=1)        # (8, p_pad)

    # One-time layout transpose (prior axis -> lanes), native dtype preserved;
    # pad the prior axis so no block ever reads past the end of the arrays.
    locs_t = jnp.transpose(predicted_locs, (0, 2, 1))                     # (N, 4, P)
    scores_t = jnp.transpose(predicted_scores, (0, 2, 1))                 # (N, C, P)
    if p_pad != P:
        locs_t = jnp.pad(locs_t, ((0, 0), (0, 0), (0, p_pad - P)))
        scores_t = jnp.pad(scores_t, ((0, 0), (0, 0), (0, p_pad - P)))

    kernel = functools.partial(_multibox_tile_kernel,
                               threshold=float(threshold),
                               n_priors=P, tile_p=tile_p)
    out = pl.pallas_call(
        kernel,
        grid=(N, n_tiles),
        in_specs=[
            pl.BlockSpec((1, NOBJ, 8), lambda i, t: (i, 0, 0)),
            pl.BlockSpec((1, 8, NOBJ), lambda i, t: (i, 0, 0)),
            pl.BlockSpec((8, p_pad), lambda i, t: (0, 0)),     # resident priors
            pl.BlockSpec((1, 4, tile_p), lambda i, t: (i, 0, t)),
            pl.BlockSpec((1, C, tile_p), lambda i, t: (i, 0, t)),
        ],
        out_specs=pl.BlockSpec((1, 3, tile_p), lambda i, t: (i, 0, t)),
        out_shape=jax.ShapeDtypeStruct((N, 3, p_pad), jnp.float32),
        compiler_params=pltpu.CompilerParams(
            dimension_semantics=("parallel", "parallel")),
    )(obj_meta, gath, pri_pack, locs_t, scores_t)

    ce = out[:, 0, :]      # (N, p_pad) per-prior cross entropy (0 on padding)
    pos = out[:, 1, :]     # (N, p_pad) positive-prior mask
    sl1 = out[:, 2, :]     # (N, p_pad) masked smooth-L1 summed over 4 coords

    n_pos = jnp.sum(pos, axis=1)                          # positives per image
    n_pos_total = jnp.sum(n_pos)
    denom = jnp.maximum(n_pos_total, 1.0)                 # guard empty-positive batch

    # SmoothL1Loss(): mean over the (n_pos_total, 4) positive rows
    loc_loss = jnp.sum(sl1) / (4.0 * denom)

    conf_pos_sum = jnp.sum(ce * pos)
    conf_neg = ce * (1.0 - pos)

    # Hard-negative mining: only the top neg_pos_ratio * n_pos negatives per
    # image are summed, so top_k with a modest static k replaces the full sort.
    # Exact whenever n_pos <= max_pos_per_image (set it to P to force exactness).
    k_hard = int(min(p_pad, neg_pos_ratio * max_pos_per_image))
    top_neg = lax.top_k(conf_neg, k_hard)[0]              # (N, k_hard), descending
    ranks = jnp.arange(k_hard, dtype=jnp.float32)[None, :]
    n_hard = jnp.minimum(float(neg_pos_ratio) * n_pos, float(k_hard))
    conf_hard_sum = jnp.sum(top_neg * (ranks < n_hard[:, None]).astype(jnp.float32))

    conf_loss = (conf_hard_sum + conf_pos_sum) / denom
    return conf_loss + alpha * loc_loss


if __name__ == "__main__":
    key = jax.random.PRNGKey(0)
    N, NOBJ, C = 2, 3, 8
    fm = 16
    P = fm * fm  # 256 priors (small stand-in for the 24k+ priors of SSD512)

    # deterministic priors: 16x16 grid of centers, fixed 0.2 x 0.2 size
    cs = (jnp.arange(fm, dtype=jnp.float32) + 0.5) / fm
    cy, cx = jnp.meshgrid(cs, cs, indexing="ij")
    priors_cxcy = jnp.stack(
        [cx.reshape(-1), cy.reshape(-1),
         jnp.full((P,), 0.2, dtype=jnp.float32),
         jnp.full((P,), 0.2, dtype=jnp.float32)], axis=1)     # (P, 4)

    k1, k2, k3, k4, k5 = jax.random.split(key, 5)
    centers = jax.random.uniform(k1, (N, NOBJ, 2), minval=0.25, maxval=0.75)
    sizes = jax.random.uniform(k2, (N, NOBJ, 2), minval=0.1, maxval=0.4)
    boxes = jnp.concatenate([centers - sizes / 2, centers + sizes / 2], axis=-1)
    labels = jax.random.randint(k3, (N, NOBJ), 1, C)          # object classes >= 1
    predicted_locs = jax.random.normal(k4, (N, P, 4), dtype=jnp.float32)
    predicted_scores = jax.random.normal(k5, (N, P, C), dtype=jnp.float32)

    loss = multibox_loss_512(predicted_locs, predicted_scores, boxes, labels,
                             priors_cxcy, threshold=0.5, neg_pos_ratio=3,
                             alpha=1.0, tile_p=128)
    loss = jax.block_until_ready(loss)
    assert bool(jnp.isfinite(loss)), "loss is not finite"
    print("KERNEL_OK")
</pallas_src>

<mosaic_0001>
module attributes {stable_mosaic.version = 11 : i64} {
  func.func @_multibox_tile_kernel(%arg0: i32, %arg1: i32, %arg2: memref<1x3x8xf32, #tpu.memory_space<vmem>>, %arg3: memref<1x8x3xf32, #tpu.memory_space<vmem>>, %arg4: memref<8x256xf32, #tpu.memory_space<vmem>>, %arg5: memref<1x4x128xf32, #tpu.memory_space<vmem>>, %arg6: memref<1x8x128xf32, #tpu.memory_space<vmem>>, %arg7: memref<1x3x128xf32, #tpu.memory_space<vmem>>) attributes {dimension_semantics = [#tpu.dimension_semantics<parallel>, #tpu.dimension_semantics<parallel>], iteration_bounds = array<i64: 2, 2>, scalar_prefetch = 0 : i64, scratch_operands = 0 : i64, tpu.core_type = #tpu.core_type<tc>, window_params = [{transform_indices = @transform_0, window_bounds = array<i64: 1, 3, 8>}, {transform_indices = @transform_1, window_bounds = array<i64: 1, 8, 3>}, {pipeline_mode = #tpu.pipeline_mode<synchronous>, transform_indices = @transform_2, window_bounds = array<i64: 8, 256>}, {transform_indices = @transform_3, window_bounds = array<i64: 1, 4, 128>}, {transform_indices = @transform_4, window_bounds = array<i64: 1, 8, 128>}, {transform_indices = @transform_5, window_bounds = array<i64: 1, 3, 128>}]} {
    %0 = tpu.iota {dimensions = array<i32: 1>} : vector<1x128xi32>
    %c128_i32 = arith.constant 128 : i32
    %1 = arith.muli %arg1, %c128_i32 : i32
    %2 = vector.broadcast %1 : i32 to vector<1x128xi32>
    %3 = arith.addi %0, %2 : vector<1x128xi32>
    %4 = arith.sitofp %3 : vector<1x128xi32> to vector<1x128xf32>
    %cst = arith.constant 2.560000e+02 : f32
    %5 = vector.broadcast %cst : f32 to vector<1x128xf32>
    %6 = arith.cmpf olt, %4, %5 : vector<1x128xf32>
    %c0 = arith.constant 0 : index
    %c0_0 = arith.constant 0 : index
    %c0_1 = arith.constant 0 : index
    %7 = vector.load %arg2[%c0, %c0_0, %c0_1] : memref<1x3x8xf32, #tpu.memory_space<vmem>>, vector<1x3x8xf32>
    %8 = vector.shape_cast %7 : vector<1x3x8xf32> to vector<3x8xf32>
    %9 = vector.extract_strided_slice %8 {offsets = [0, 0], sizes = [3, 1], strides = [1, 1]} : vector<3x8xf32> to vector<3x1xf32>
    %10 = vector.extract_strided_slice %8 {offsets = [0, 1], sizes = [3, 1], strides = [1, 1]} : vector<3x8xf32> to vector<3x1xf32>
    %11 = vector.extract_strided_slice %8 {offsets = [0, 2], sizes = [3, 1], strides = [1, 1]} : vector<3x8xf32> to vector<3x1xf32>
    %12 = vector.extract_strided_slice %8 {offsets = [0, 3], sizes = [3, 1], strides = [1, 1]} : vector<3x8xf32> to vector<3x1xf32>
    %13 = vector.extract_strided_slice %8 {offsets = [0, 5], sizes = [3, 1], strides = [1, 1]} : vector<3x8xf32> to vector<3x1xf32>
    %14 = vector.extract_strided_slice %8 {offsets = [0, 6], sizes = [3, 1], strides = [1, 1]} : vector<3x8xf32> to vector<3x1xf32>
    %15 = vector.extract_strided_slice %8 {offsets = [0, 7], sizes = [3, 1], strides = [1, 1]} : vector<3x8xf32> to vector<3x1xf32>
    %c128_i32_2 = arith.constant 128 : i32
    %16 = arith.muli %arg1, %c128_i32_2 : i32
    %17 = tpu.assume_multiple %16, 128 : i32
    %c0_3 = arith.constant 0 : index
    %18 = arith.index_cast %17 : i32 to index
    %19 = vector.load %arg4[%c0_3, %18] : memref<8x256xf32, #tpu.memory_space<vmem>>, vector<8x128xf32>
    %20 = vector.extract_strided_slice %19 {offsets = [0, 0], sizes = [1, 128], strides = [1, 1]} : vector<8x128xf32> to vector<1x128xf32>
    %21 = vector.extract_strided_slice %19 {offsets = [1, 0], sizes = [1, 128], strides = [1, 1]} : vector<8x128xf32> to vector<1x128xf32>
    %22 = vector.extract_strided_slice %19 {offsets = [2, 0], sizes = [1, 128], strides = [1, 1]} : vector<8x128xf32> to vector<1x128xf32>
    %23 = vector.extract_strided_slice %19 {offsets = [3, 0], sizes = [1, 128], strides = [1, 1]} : vector<8x128xf32> to vector<1x128xf32>
    %24 = vector.extract_strided_slice %19 {offsets = [4, 0], sizes = [1, 128], strides = [1, 1]} : vector<8x128xf32> to vector<1x128xf32>
    %25 = vector.extract_strided_slice %19 {offsets = [5, 0], sizes = [1, 128], strides = [1, 1]} : vector<8x128xf32> to vector<1x128xf32>
    %26 = vector.extract_strided_slice %19 {offsets = [6, 0], sizes = [1, 128], strides = [1, 1]} : vector<8x128xf32> to vector<1x128xf32>
    %27 = vector.extract_strided_slice %19 {offsets = [7, 0], sizes = [1, 128], strides = [1, 1]} : vector<8x128xf32> to vector<1x128xf32>
    %28 = vector.broadcast %11 : vector<3x1xf32> to vector<3x128xf32>
    %29 = vector.broadcast %22 : vector<1x128xf32> to vector<3x128xf32>
    %30 = arith.minimumf %28, %29 : vector<3x128xf32>
    %31 = vector.broadcast %9 : vector<3x1xf32> to vector<3x128xf32>
    %32 = vector.broadcast %20 : vector<1x128xf32> to vector<3x128xf32>
    %33 = arith.maximumf %31, %32 : vector<3x128xf32>
    %34 = arith.subf %30, %33 : vector<3x128xf32>
    %cst_4 = arith.constant 0.000000e+00 : f32
    %35 = vector.broadcast %cst_4 : f32 to vector<3x128xf32>
    %36 = arith.maximumf %34, %35 : vector<3x128xf32>
    %37 = vector.broadcast %12 : vector<3x1xf32> to vector<3x128xf32>
    %38 = vector.broadcast %23 : vector<1x128xf32> to vector<3x128xf32>
    %39 = arith.minimumf %37, %38 : vector<3x128xf32>
    %40 = vector.broadcast %10 : vector<3x1xf32> to vector<3x128xf32>
    %41 = vector.broadcast %21 : vector<1x128xf32> to vector<3x128xf32>
    %42 = arith.maximumf %40, %41 : vector<3x128xf32>
    %43 = arith.subf %39, %42 : vector<3x128xf32>
    %cst_5 = arith.constant 0.000000e+00 : f32
    %44 = vector.broadcast %cst_5 : f32 to vector<3x128xf32>
    %45 = arith.maximumf %43, %44 : vector<3x128xf32>
    %46 = arith.mulf %36, %45 : vector<3x128xf32>
    %47 = arith.subf %11, %9 : vector<3x1xf32>
    %48 = arith.subf %12, %10 : vector<3x1xf32>
    %49 = arith.mulf %47, %48 : vector<3x1xf32>
    %50 = arith.subf %22, %20 : vector<1x128xf32>
    %51 = arith.subf %23, %21 : vector<1x128xf32>
    %52 = arith.mulf %50, %51 : vector<1x128xf32>
    %53 = vector.broadcast %49 : vector<3x1xf32> to vector<3x128xf32>
    %54 = vector.broadcast %52 : vector<1x128xf32> to vector<3x128xf32>
    %55 = arith.addf %53, %54 : vector<3x128xf32>
    %56 = arith.subf %55, %46 : vector<3x128xf32>
    %57 = arith.divf %46, %56 : vector<3x128xf32>
    %58 = tpu.iota {dimensions = array<i32: 0>} : vector<3x128xi32>
    %59 = arith.sitofp %58 : vector<3x128xi32> to vector<3x128xf32>
    %cst_6 = arith.constant dense<0xFF800000> : vector<128xf32>
    %60 = vector.multi_reduction <maximumf>, %57, %cst_6 [0] : vector<3x128xf32> to vector<128xf32>
    %61 = vector.shape_cast %60 : vector<128xf32> to vector<1x128xf32>
    %62 = vector.broadcast %61 : vector<1x128xf32> to vector<3x128xf32>
    %63 = arith.cmpf oeq, %57, %62 : vector<3x128xf32>
    %cst_7 = arith.constant 3.000000e+00 : f32
    %64 = vector.broadcast %cst_7 : f32 to vector<3x128xf32>
    %65 = arith.select %63, %59, %64 : vector<3x128xi1>, vector<3x128xf32>
    %cst_8 = arith.constant dense<0x7F800000> : vector<128xf32>
    %66 = vector.multi_reduction <minimumf>, %65, %cst_8 [0] : vector<3x128xf32> to vector<128xf32>
    %67 = vector.shape_cast %66 : vector<128xf32> to vector<1x128xf32>
    %68 = vector.broadcast %4 : vector<1x128xf32> to vector<3x128xf32>
    %69 = vector.broadcast %13 : vector<3x1xf32> to vector<3x128xf32>
    %70 = arith.cmpf oeq, %68, %69 : vector<3x128xf32>
    %cst_9 = arith.constant 0.000000e+00 : f32
    %71 = vector.broadcast %cst_9 : f32 to vector<3x1xf32>
    %72 = arith.cmpf ogt, %14, %71 : vector<3x1xf32>
    %73 = vector.broadcast %72 : vector<3x1xi1> to vector<3x128xi1>
    %74 = arith.andi %70, %73 : vector<3x128xi1>
    %cst_10 = arith.constant -1.000000e+00 : f32
    %75 = vector.shape_cast %15 : vector<3x1xf32> to vector<3x1xf32>
    %76 = vector.broadcast %75 : vector<3x1xf32> to vector<3x128xf32>
    %77 = vector.broadcast %cst_10 : f32 to vector<3x128xf32>
    %78 = arith.select %74, %76, %77 : vector<3x128xi1>, vector<3x128xf32>
    %cst_11 = arith.constant dense<0xFF800000> : vector<128xf32>
    %79 = vector.multi_reduction <maximumf>, %78, %cst_11 [0] : vector<3x128xf32> to vector<128xf32>
    %80 = vector.shape_cast %79 : vector<128xf32> to vector<1x128xf32>
    %cst_12 = arith.constant 0.000000e+00 : f32
    %81 = vector.broadcast %cst_12 : f32 to vector<1x128xf32>
    %82 = arith.cmpf oge, %80, %81 : vector<1x128xf32>
    %83 = arith.select %82, %80, %67 : vector<1x128xi1>, vector<1x128xf32>
    %cst_13 = arith.constant 1.000000e+00 : f32
    %84 = vector.broadcast %cst_13 : f32 to vector<1x128xf32>
    %85 = arith.select %82, %84, %61 : vector<1x128xi1>, vector<1x128xf32>
    %cst_14 = arith.constant 5.000000e-01 : f32
    %86 = vector.broadcast %cst_14 : f32 to vector<1x128xf32>
    %87 = arith.cmpf oge, %85, %86 : vector<1x128xf32>
    %88 = vector.broadcast %83 : vector<1x128xf32> to vector<3x128xf32>
    %89 = arith.cmpf oeq, %59, %88 : vector<3x128xf32>
    %90 = arith.extui %89 : vector<3x128xi1> to vector<3x128xi32>
    %91 = arith.sitofp %90 : vector<3x128xi32> to vector<3x128xf32>
    %c0_15 = arith.constant 0 : index
    %c0_16 = arith.constant 0 : index
    %c0_17 = arith.constant 0 : index
    %92 = vector.load %arg3[%c0_15, %c0_16, %c0_17] : memref<1x8x3xf32, #tpu.memory_space<vmem>>, vector<1x8x3xf32>
    %93 = vector.shape_cast %92 : vector<1x8x3xf32> to vector<8x3xf32>
    %cst_18 = arith.constant dense<0.000000e+00> : vector<8x128xf32>
    %94 = tpu.matmul %93, %91, %cst_18 {dimension_numbers = #tpu.dot_dimension_numbers<[1], [0], [0], [1], [0, 0, 1, 1], [], []>, precision = #tpu.contract_precision<fp32>} : vector<8x3xf32>, vector<3x128xf32>, vector<8x128xf32> -> vector<8x128xf32>
    %95 = vector.extract_strided_slice %94 {offsets = [0, 0], sizes = [1, 128], strides = [1, 1]} : vector<8x128xf32> to vector<1x128xf32>
    %96 = vector.extract_strided_slice %94 {offsets = [1, 0], sizes = [1, 128], strides = [1, 1]} : vector<8x128xf32> to vector<1x128xf32>
    %97 = vector.extract_strided_slice %94 {offsets = [2, 0], sizes = [1, 128], strides = [1, 1]} : vector<8x128xf32> to vector<1x128xf32>
    %98 = vector.extract_strided_slice %94 {offsets = [3, 0], sizes = [1, 128], strides = [1, 1]} : vector<8x128xf32> to vector<1x128xf32>
    %99 = vector.extract_strided_slice %94 {offsets = [4, 0], sizes = [1, 128], strides = [1, 1]} : vector<8x128xf32> to vector<1x128xf32>
    %cst_19 = arith.constant 0.000000e+00 : f32
    %100 = vector.broadcast %cst_19 : f32 to vector<1x128xf32>
    %101 = arith.select %87, %95, %100 : vector<1x128xi1>, vector<1x128xf32>
    %cst_20 = arith.constant 5.000000e-01 : f32
    %102 = vector.broadcast %cst_20 : f32 to vector<1x128xf32>
    %103 = arith.cmpf ogt, %101, %102 : vector<1x128xf32>
    %104 = arith.andi %103, %6 : vector<1x128xi1>
    %cst_21 = arith.constant 1.000000e+00 : f32
    %cst_22 = arith.constant 0.000000e+00 : f32
    %105 = vector.broadcast %cst_21 : f32 to vector<1x128xf32>
    %106 = vector.broadcast %cst_22 : f32 to vector<1x128xf32>
    %107 = arith.select %104, %105, %106 : vector<1x128xi1>, vector<1x128xf32>
    %cst_23 = arith.constant 5.000000e-01 : f32
    %108 = vector.broadcast %cst_23 : f32 to vector<1x128xf32>
    %109 = arith.cmpf ogt, %107, %108 : vector<1x128xf32>
    %c0_24 = arith.constant 0 : index
    %c0_25 = arith.constant 0 : index
    %c0_26 = arith.constant 0 : index
    %110 = vector.load %arg5[%c0_24, %c0_25, %c0_26] : memref<1x4x128xf32, #tpu.memory_space<vmem>>, vector<1x4x128xf32>
    %111 = vector.shape_cast %110 : vector<1x4x128xf32> to vector<4x128xf32>
    %c0_27 = arith.constant 0 : index
    %c0_28 = arith.constant 0 : index
    %c0_29 = arith.constant 0 : index
    %112 = vector.load %arg6[%c0_27, %c0_28, %c0_29] : memref<1x8x128xf32, #tpu.memory_space<vmem>>, vector<1x8x128xf32>
    %113 = vector.shape_cast %112 : vector<1x8x128xf32> to vector<8x128xf32>
    %114 = arith.addf %96, %98 : vector<1x128xf32>
    %cst_30 = arith.constant 5.000000e-01 : f32
    %115 = vector.broadcast %cst_30 : f32 to vector<1x128xf32>
    %116 = arith.mulf %114, %115 : vector<1x128xf32>
    %117 = arith.addf %97, %99 : vector<1x128xf32>
    %cst_31 = arith.constant 5.000000e-01 : f32
    %118 = vector.broadcast %cst_31 : f32 to vector<1x128xf32>
    %119 = arith.mulf %117, %118 : vector<1x128xf32>
    %120 = arith.subf %98, %96 : vector<1x128xf32>
    %121 = arith.subf %99, %97 : vector<1x128xf32>
    %122 = arith.select %109, %120, %26 : vector<1x128xi1>, vector<1x128xf32>
    %123 = arith.select %109, %121, %27 : vector<1x128xi1>, vector<1x128xf32>
    %124 = arith.subf %116, %24 : vector<1x128xf32>
    %cst_32 = arith.constant 1.000000e+01 : f32
    %125 = vector.broadcast %cst_32 : f32 to vector<1x128xf32>
    %126 = arith.mulf %124, %125 : vector<1x128xf32>
    %127 = arith.divf %126, %26 : vector<1x128xf32>
    %128 = arith.subf %119, %25 : vector<1x128xf32>
    %cst_33 = arith.constant 1.000000e+01 : f32
    %129 = vector.broadcast %cst_33 : f32 to vector<1x128xf32>
    %130 = arith.mulf %128, %129 : vector<1x128xf32>
    %131 = arith.divf %130, %27 : vector<1x128xf32>
    %132 = arith.divf %122, %26 : vector<1x128xf32>
    %133 = math.log %132 : vector<1x128xf32>
    %cst_34 = arith.constant 5.000000e+00 : f32
    %134 = vector.broadcast %cst_34 : f32 to vector<1x128xf32>
    %135 = arith.mulf %133, %134 : vector<1x128xf32>
    %136 = arith.divf %123, %27 : vector<1x128xf32>
    %137 = math.log %136 : vector<1x128xf32>
    %cst_35 = arith.constant 5.000000e+00 : f32
    %138 = vector.broadcast %cst_35 : f32 to vector<1x128xf32>
    %139 = arith.mulf %137, %138 : vector<1x128xf32>
    %140 = vector.extract_strided_slice %111 {offsets = [0, 0], sizes = [1, 128], strides = [1, 1]} : vector<4x128xf32> to vector<1x128xf32>
    %141 = arith.subf %140, %127 : vector<1x128xf32>
    %cst_36 = arith.constant 0.000000e+00 : f32
    %142 = vector.broadcast %cst_36 : f32 to vector<1x128xf32>
    %143 = arith.select %109, %141, %142 : vector<1x128xi1>, vector<1x128xf32>
    %144 = vector.extract_strided_slice %111 {offsets = [1, 0], sizes = [1, 128], strides = [1, 1]} : vector<4x128xf32> to vector<1x128xf32>
    %145 = arith.subf %144, %131 : vector<1x128xf32>
    %cst_37 = arith.constant 0.000000e+00 : f32
    %146 = vector.broadcast %cst_37 : f32 to vector<1x128xf32>
    %147 = arith.select %109, %145, %146 : vector<1x128xi1>, vector<1x128xf32>
    %148 = vector.extract_strided_slice %111 {offsets = [2, 0], sizes = [1, 128], strides = [1, 1]} : vector<4x128xf32> to vector<1x128xf32>
    %149 = arith.subf %148, %135 : vector<1x128xf32>
    %cst_38 = arith.constant 0.000000e+00 : f32
    %150 = vector.broadcast %cst_38 : f32 to vector<1x128xf32>
    %151 = arith.select %109, %149, %150 : vector<1x128xi1>, vector<1x128xf32>
    %152 = vector.extract_strided_slice %111 {offsets = [3, 0], sizes = [1, 128], strides = [1, 1]} : vector<4x128xf32> to vector<1x128xf32>
    %153 = arith.subf %152, %139 : vector<1x128xf32>
    %cst_39 = arith.constant 0.000000e+00 : f32
    %154 = vector.broadcast %cst_39 : f32 to vector<1x128xf32>
    %155 = arith.select %109, %153, %154 : vector<1x128xi1>, vector<1x128xf32>
    %156 = math.absf %143 : vector<1x128xf32>
    %cst_40 = arith.constant 1.000000e+00 : f32
    %157 = vector.broadcast %cst_40 : f32 to vector<1x128xf32>
    %158 = arith.cmpf olt, %156, %157 : vector<1x128xf32>
    %cst_41 = arith.constant 5.000000e-01 : f32
    %159 = vector.broadcast %cst_41 : f32 to vector<1x128xf32>
    %160 = arith.mulf %159, %143 : vector<1x128xf32>
    %161 = arith.mulf %160, %143 : vector<1x128xf32>
    %cst_42 = arith.constant 5.000000e-01 : f32
    %162 = vector.broadcast %cst_42 : f32 to vector<1x128xf32>
    %163 = arith.subf %156, %162 : vector<1x128xf32>
    %164 = arith.select %158, %161, %163 : vector<1x128xi1>, vector<1x128xf32>
    %165 = math.absf %147 : vector<1x128xf32>
    %cst_43 = arith.constant 1.000000e+00 : f32
    %166 = vector.broadcast %cst_43 : f32 to vector<1x128xf32>
    %167 = arith.cmpf olt, %165, %166 : vector<1x128xf32>
    %cst_44 = arith.constant 5.000000e-01 : f32
    %168 = vector.broadcast %cst_44 : f32 to vector<1x128xf32>
    %169 = arith.mulf %168, %147 : vector<1x128xf32>
    %170 = arith.mulf %169, %147 : vector<1x128xf32>
    %cst_45 = arith.constant 5.000000e-01 : f32
    %171 = vector.broadcast %cst_45 : f32 to vector<1x128xf32>
    %172 = arith.subf %165, %171 : vector<1x128xf32>
    %173 = arith.select %167, %170, %172 : vector<1x128xi1>, vector<1x128xf32>
    %174 = arith.addf %164, %173 : vector<1x128xf32>
    %175 = math.absf %151 : vector<1x128xf32>
    %cst_46 = arith.constant 1.000000e+00 : f32
    %176 = vector.broadcast %cst_46 : f32 to vector<1x128xf32>
    %177 = arith.cmpf olt, %175, %176 : vector<1x128xf32>
    %cst_47 = arith.constant 5.000000e-01 : f32
    %178 = vector.broadcast %cst_47 : f32 to vector<1x128xf32>
    %179 = arith.mulf %178, %151 : vector<1x128xf32>
    %180 = arith.mulf %179, %151 : vector<1x128xf32>
    %cst_48 = arith.constant 5.000000e-01 : f32
    %181 = vector.broadcast %cst_48 : f32 to vector<1x128xf32>
    %182 = arith.subf %175, %181 : vector<1x128xf32>
    %183 = arith.select %177, %180, %182 : vector<1x128xi1>, vector<1x128xf32>
    %184 = arith.addf %174, %183 : vector<1x128xf32>
    %185 = math.absf %155 : vector<1x128xf32>
    %cst_49 = arith.constant 1.000000e+00 : f32
    %186 = vector.broadcast %cst_49 : f32 to vector<1x128xf32>
    %187 = arith.cmpf olt, %185, %186 : vector<1x128xf32>
    %cst_50 = arith.constant 5.000000e-01 : f32
    %188 = vector.broadcast %cst_50 : f32 to vector<1x128xf32>
    %189 = arith.mulf %188, %155 : vector<1x128xf32>
    %190 = arith.mulf %189, %155 : vector<1x128xf32>
    %cst_51 = arith.constant 5.000000e-01 : f32
    %191 = vector.broadcast %cst_51 : f32 to vector<1x128xf32>
    %192 = arith.subf %185, %191 : vector<1x128xf32>
    %193 = arith.select %187, %190, %192 : vector<1x128xi1>, vector<1x128xf32>
    %194 = arith.addf %184, %193 : vector<1x128xf32>
    %cst_52 = arith.constant dense<0xFF800000> : vector<128xf32>
    %195 = vector.multi_reduction <maximumf>, %113, %cst_52 [0] : vector<8x128xf32> to vector<128xf32>
    %196 = vector.shape_cast %195 : vector<128xf32> to vector<1x128xf32>
    %197 = vector.broadcast %196 : vector<1x128xf32> to vector<8x128xf32>
    %198 = arith.subf %113, %197 : vector<8x128xf32>
    %199 = math.exp %198 : vector<8x128xf32>
    %cst_53 = arith.constant dense<0.000000e+00> : vector<128xf32>
    %200 = vector.multi_reduction <add>, %199, %cst_53 [0] : vector<8x128xf32> to vector<128xf32>
    %201 = vector.shape_cast %200 : vector<128xf32> to vector<1x128xf32>
    %202 = math.log %201 : vector<1x128xf32>
    %203 = arith.addf %196, %202 : vector<1x128xf32>
    %204 = tpu.iota {dimensions = array<i32: 0>} : vector<8x128xi32>
    %205 = arith.sitofp %204 : vector<8x128xi32> to vector<8x128xf32>
    %206 = vector.broadcast %101 : vector<1x128xf32> to vector<8x128xf32>
    %207 = arith.subf %205, %206 : vector<8x128xf32>
    %208 = math.absf %207 : vector<8x128xf32>
    %cst_54 = arith.constant 5.000000e-01 : f32
    %209 = vector.broadcast %cst_54 : f32 to vector<8x128xf32>
    %210 = arith.cmpf olt, %208, %209 : vector<8x128xf32>
    %211 = arith.extui %210 : vector<8x128xi1> to vector<8x128xi32>
    %212 = arith.sitofp %211 : vector<8x128xi32> to vector<8x128xf32>
    %213 = arith.mulf %113, %212 : vector<8x128xf32>
    %cst_55 = arith.constant dense<0.000000e+00> : vector<128xf32>
    %214 = vector.multi_reduction <add>, %213, %cst_55 [0] : vector<8x128xf32> to vector<128xf32>
    %215 = vector.shape_cast %214 : vector<128xf32> to vector<1x128xf32>
    %216 = arith.subf %203, %215 : vector<1x128xf32>
    %cst_56 = arith.constant 0.000000e+00 : f32
    %217 = vector.broadcast %cst_56 : f32 to vector<1x128xf32>
    %218 = arith.select %6, %216, %217 : vector<1x128xi1>, vector<1x128xf32>
    %219 = tpu.concatenate %218, %107, %194 in 0 : vector<1x128xf32>, vector<1x128xf32>, vector<1x128xf32> -> vector<3x128xf32>
    %220 = vector.shape_cast %219 : vector<3x128xf32> to vector<1x3x128xf32>
    %c0_57 = arith.constant 0 : index
    %c0_58 = arith.constant 0 : index
    %c0_59 = arith.constant 0 : index
    %221 = vector.load %arg7[%c0_57, %c0_58, %c0_59] : memref<1x3x128xf32, #tpu.memory_space<vmem>>, vector<1x3x128xf32>
    tpu.vector_store %arg7[%c0_57, %c0_58, %c0_59], %220 {strides = array<i32>} : memref<1x3x128xf32, #tpu.memory_space<vmem>>, vector<1x3x128xf32>,
    return
  }
  func.func @transform_0(%arg0: i32, %arg1: i32) -> (i32, i32, i32) {
    %c0_i32 = arith.constant 0 : i32
    %c0_i32_0 = arith.constant 0 : i32
    %c0_i32_1 = arith.constant 0 : i32
    return %arg0, %c0_i32, %c0_i32_0 : i32, i32, i32
  }
  func.func @transform_1(%arg0: i32, %arg1: i32) -> (i32, i32, i32) {
    %c0_i32 = arith.constant 0 : i32
    %c0_i32_0 = arith.constant 0 : i32
    %c0_i32_1 = arith.constant 0 : i32
    return %arg0, %c0_i32, %c0_i32_0 : i32, i32, i32
  }
  func.func @transform_2(%arg0: i32, %arg1: i32) -> (i32, i32) {
    %c0_i32 = arith.constant 0 : i32
    %c0_i32_0 = arith.constant 0 : i32
    %c0_i32_1 = arith.constant 0 : i32
    return %c0_i32, %c0_i32_0 : i32, i32
  }
  func.func @transform_3(%arg0: i32, %arg1: i32) -> (i32, i32, i32) {
    %c0_i32 = arith.constant 0 : i32
    %c0_i32_0 = arith.constant 0 : i32
    return %arg0, %c0_i32, %arg1 : i32, i32, i32
  }
  func.func @transform_4(%arg0: i32, %arg1: i32) -> (i32, i32, i32) {
    %c0_i32 = arith.constant 0 : i32
    %c0_i32_0 = arith.constant 0 : i32
    return %arg0, %c0_i32, %arg1 : i32, i32, i32
  }
  func.func @transform_5(%arg0: i32, %arg1: i32) -> (i32, i32, i32) {
    %c0_i32 = arith.constant 0 : i32
    %c0_i32_0 = arith.constant 0 : i32
    return %arg0, %c0_i32, %arg1 : i32, i32, i32
  }
}

</mosaic_0001>

<bundles_post_ra>
// kernel: tpu_custom_call.1
= control target key start
LH: loop header
LB: loop body
LE: loop exit
PB: predicated region body
PF: predicated region fallthrough
CT: control target
= control target key end

     0   :  { %10 = vsyncpa [#allocation3], 0  ;;  %s1805_s0 = inlined_call_operand.vmem [shape: f32[2,3,8], index: 0, kind: input, shape index: {}]   ;;  %s1806_s1 = inlined_call_operand.vmem [shape: f32[2,8,3], index: 1, kind: input, shape index: {}]   ;;  %s1807_s2 = inlined_call_operand.vmem [shape: f32[8,256], index: 2, kind: input, shape index: {}]   ;;  %s1808_s3 = inlined_call_operand.hbm [shape: f32[2,4,256], index: 3, kind: input, shape index: {}]   ;;  %s1809_s4 = inlined_call_operand.vmem [shape: f32[2,8,256], index: 4, kind: input, shape index: {}]   ;;  %s1810_s5 = inlined_call_operand.vmem [shape: f32[2,3,256], index: 5, kind: output, shape index: {}]  }
   0x1   :  { %12 = vsyncpa [#allocation3 + $0x1], 0  ;;  %s1526_s18 = smov 0   ;;  %s1528_s19 = smov 0  }
   0x2   :  { %s1530_s20 = smov 0   ;;  %s1532_s21 = smov 0  }
   0x3   :  { %s1534_s22 = smov 0   ;;  %s1536_s23 = smov 0  }
   0x4   :  { %s1538_s24 = smov 0   ;;  %s1540_s25 = smov 0  }
   0x5 LB: > { %s1200_s26 = sadd.s32 4294967295, %s1482_s25   ;;  %s27_s27 = sadd.s32 1, %s1474_s23  ;;  %s1482_s25 = sphi %s1540_s25, %s18_s25   ;;  %s1478_s24 = sphi %s1538_s24, %s1827_s24   ;;  %s1474_s23 = sphi %s1536_s23, %s1826_s23   ;;  %s1470_s22 = sphi %s1534_s22, %s1825_s22   ;;  %s1466_s21 = sphi %s1532_s21, %s1824_s21   ;;  %s1462_s20 = sphi %s1530_s20, %s1823_s20   ;;  %s1458_s19 = sphi %s1528_s19, %s1822_s19   ;;  %s1454_s18 = sphi %s1526_s18, %s1821_s18  }
   0x6   : > { %p28_p0 = scmp.ge.s32.totalorder %s27_s27, 2  ;;  %s30_s28 = sadd.s32 1, %s1478_s24 }
   0x7   : > { %s112_s29 = sadd.s32 1, %s1462_s20  ;;  %p119_p1 = scmp.ne.s32.totalorder %s1462_s20, %s1458_s19 }
   0x8   : > { %s1829_s27 = smov (%p28_p0, %s27_s27), 0  ;;  %s1831_s28 = smov (!%p28_p0, %s30_s28), %s1478_s24 }
   0x9   : > { %1812 = sst [smem:[#allocation5_spill]] %s1829_s27  ;;  %s108_s30 = ssub.s32 %s1474_s23, %s1829_s27 }
   0xa   : > { %p120_p2 = scmp.eq.s32.totalorder %s1482_s25, 0  ;;  %p32_p3 = scmp.ge.s32.totalorder %s1831_s28, 2 }
   0xb   : > { %p125_p4 = scmp.ne.s32.totalorder %s1458_s19, %s1454_s18  ;;  %p126_p6 = scmp.eq.s32.totalorder %s1200_s26, 0 }
   0xc   : > { %p1577_p5 = por %p120_p2, %p119_p1  ;;  %s1833_s28 = smov (%p32_p3, %s1831_s28), 0 }
   0xd   : > { %p1583_p7 = por %p126_p6, %p125_p4  ;;  %s107_s8 = ssub.s32 %s1478_s24, %s1833_s28 }
   0xe   : > { %p1285_p8 = scmp.lt.s32.totalorder %s1482_s25, 4  ;;  %s109_s9 = sor.u32 %s108_s30, %s107_s8 }
   0xf   : > { %s222_s10 = sand.u32 1, %s1462_s20   ;;  %p110_p9 = scmp.eq.s32.totalorder %s109_s9, 0 }
  0x10   : > { %s1204_s11 = sshll.u32 %s222_s10, 2  ;;  %s1205_s12 = sshll.u32 %s1478_s24, 1 }
  0x11   : > { %s1593_s13 = scalar_select %p110_p9, %s1462_s20, %s112_s29  }
  0x12   : > { %s231_s14 = sadd.s32 %s1474_s23, %s1205_s12  ;;  %s226_s16 = scalar_lea.vmem [#allocation2], %s1204_s11 }
  0x13   : > { %s1206_s15 = sshll.u32 %s231_s14, 6  ;;  %s235_s17 = sshll.u32 %s226_s16, 4  ;;  %s1601_s17 = int_to_ptr.vmem [resolvable:$true] %s235_s17 }
  0x14   : > { %s1599_s27 = scalar_lea.hbm %s1808_s3, %s1206_s15  ;;  %p1607_p10 = pnand %p1285_p8, %p1577_p5 }
  0x15   : > { %s223_s30 = scalar_lea.sflag [#allocation3], %s222_s10  ;;  %s1386_s8 = scalar_lea.hbm %s1599_s27, 64 }
  0x16   : > { %p1387_p13 = scmp.ne.s32.totalorder %s1599_s27, %s1386_s8  ;;  %p1388_p0 = pneg %p1607_p10 }
  0x17   : > { %s1391_s11 = scalar_lea.hbm %s1808_s3, 256  ;;  %p1392_p3 = scmp.lt.u32.totalorder %s1599_s27, %s1808_s3 }
  0x18   : > { %p1389_p1 = pnand %p1388_p0, %p1387_p13  ;;  %p1393_p4 = scmp.lt.u32.totalorder %s1391_s11, %s1386_s8 }
  0x19   : > { %p1395_p6 = scmp.lt.u32.totalorder %s1386_s8, %s1599_s27 }
  0x1a   : > { %p1390_p2 = pneg %p1389_p1  ;;  %p1394_p5 = por %p1393_p4, %p1392_p3 }
  0x1c   : > { %p1396_p8 = por %p1395_p6, %p1394_p5 }
  0x1e   : > { %p1397_p9 = pnand %p1396_p8, %p1390_p2 }
  0x20   : > { %1400 = shalt.err (!%p1397_p9)
}
  0x21   : > { %s1401_s10 = scalar_lea.vmem %s1601_s17, 64  ;;  %s1484_s15 = smov [#allocation2]  }
  0x22   : > { %p1402_p13 = scmp.ne.s32.totalorder %s1601_s17, %s1401_s10  ;;  %s1406_s16 = sshll.u32 %s1484_s15, 4  ;;  %s1407_s16 = int_to_ptr.vmem [resolvable:$false] %s1406_s16 }
  0x23   : > { %s1408_s18 = scalar_lea.vmem %s1407_s16, 128  ;;  %p1409_p12 = scmp.lt.s32.totalorder %s1601_s17, %s1407_s16 }
  0x24   : > { %p1404_p1 = pnand %p1402_p13, %p1388_p0  ;;  %p1410_p3 = scmp.lt.s32.totalorder %s1408_s18, %s1401_s10 }
  0x26   : > { %p1405_p11 = pneg %p1404_p1  ;;  %p1411_p4 = por %p1410_p3, %p1409_p12 }
  0x28   : > { %p1412_p5 = pnand %p1411_p4, %p1405_p11 }
  0x2a   : > { %1415 = shalt.err (!%p1412_p5)
}
  0x2b   : > { %1284 = dma.hbm_to_vmem [thread:$0]  (!%p1607_p10), %s1599_s27, 64, %s1601_s17, %s223_s30  }
  0x2c   : > { %p1816_p2 = scmp.lt.s32.totalorder %s1482_s25, 5  ;;  %p1817_p6 = scmp.ge.s32.totalorder %s1482_s25, 1 }
  0x2e   : > { %p252_p0 = pnand %p1817_p6, %p1816_p2 }
  0x2f   : > { %s257_s26 = sand.u32 (!%p252_p0), 1, %s1458_s19  }
  0x30   : > { %255 = sbr.rel (%p252_p0) target bundleno = 748 (0x2ec), region = 40  ;;  %s1643_s8 = sshll.u32 (!%p252_p0), %s257_s26, 2 }
  0x31   : > { %s258_s9 = scalar_lea.sflag (!%p252_p0), [#allocation3], %s257_s26  ;;  %s261_s6 = scalar_lea.vmem (!%p252_p0), [#allocation2], %s1643_s8 }
  0x37   : > { %1449 = dma.done.wait (%p1583_p7), %s258_s9, 64  }
  0x38   : > { %1451 = vsyncadd (%p1583_p7), %s258_s9, 4294967232  ;;  %p307_p10 = scmp.lt.s32.totalorder %s1470_s22, 1  ;;  %v1485_v0 = vmov 2   ;;  %v1486_v1 = vmov 3   ;;  %s1487_s11 = smov 2   ;;  %v1488_v3 = vmov 0   ;;  %v331_v14 = vlaneseq }
  0x39   : > { %1361 = vset.pattern.permute.xlu1 %v1485_v0  ;;  %1363 = vset.pattern.permute.xlu0 %v1486_v1  ;;  %v1489_v4 = vmov 1   ;;  %s1490_s7 = smov 127   ;;  %v1491_v7 = vmov 5   ;;  %v1492_v8 = vmov 7   ;;  %v1493_v12 = vmov 6   ;;  %s1215_s12 = sshll.u32 %s1466_s21, 7 }
  0x3a   : > { %s1835_s22 = smov (!%p307_p10, %s1470_s22), 1  ;;  %v1494_v13 = vmov 0.0   ;;  %vm1495_vm1 = vmmov 0   ;;  %s339_s14 = sshra.s32 %s1215_s12, 7  ;;  %v1665_v16 = vshrl.u32 %v331_v14, 7  ;;  %v332_v39 = vand.u32 127, %v331_v14 }
  0x3b   : > { %s1209_s27 = sshll.u32 %s1835_s22, 2  ;;  %1240 = vmatprep.subr.mxu1 %v1494_v13  ;;  %1255 = vmatprep.subr.mxu0 %v1494_v13  ;;  %s1216_s10 = sshll.u32 %s339_s14, 3  ;;  %v334_v40 = vstv %s1215_s12  ;;  %vm419_vm5 = vcmask 1042432   ;;  %vm468_vm6 = vcmask 23552  }
  0x3c   : > { %s310_s30 = scalar_lea.vmem %s1805_s0, %s1209_s27  ;;  %1257 = vmatprep.mubr.msk.f32.mxu0 %vm1495_vm1, %v1494_v13  ;;  %1242 = vmatprep.mubr.msk.f32.mxu1 %vm1495_vm1, %v1494_v13  ;;  %s342_s18 = scalar_lea.vmem %s1807_s2, %s1216_s10  ;;  %v351_v18 = vsub.s32 2, %v1665_v16  ;;  %v360_v20 = vsub.s32 0, %v1665_v16  ;;  %v380_v21 = vsub.s32 1, %v1665_v16  ;;  %v371_v22 = vsub.s32 3, %v1665_v16 }
  0x3d   : > { %v338_v2 = vld [vmem:[%s310_s30] sm:$0x7]  ;;  %v1687_v44 = vadd.s32 %v334_v40, %v332_v39  ;;  %s1210_s26 = sshll.u32 %s1835_s22, 3  ;;  %p317_p7 = scmp.lt.s32.totalorder %s1466_s21, 1 }
  0x3e   : > { %386 = vrot.lane.b32.xlu0 %v338_v2, %s1487_s11  ;;  %346 = vperm.xlu1 %1361, %v338_v2   ;;  %vm441_vm0 = vcmp.gt.f32.partialorder %v338_v2, 0.0  ;;  %v1670_v17 = vld [vmem:[%s342_s18] sm:$0xff]  ;;  %s314_s17 = scalar_lea.vmem %s1806_s1, %s1210_s26  ;;  %s1211_s29 = sshll.u32 %s1835_s22, 1 }
  0x3f   : > { %v442_v11 = vsel %vm441_vm0, 1, %v1488_v3  ;;  %v1677_v23 = vrot.slane %v1670_v17, 6  ;;  %v352_v24 = vrot.slane %v1670_v17, %v351_v18  ;;  %v361_v25 = vrot.slane %v1670_v17, %v360_v20  ;;  %s1837_s21 = smov (!%p317_p7, %s1466_s21), 1 }
  0x40   : > { %v381_v26 = vrot.slane %v1670_v17, %v380_v21  ;;  %v372_v27 = vrot.slane %v1670_v17, %v371_v22  ;;  %v336_v48 = vcvt.s32.f32 %v1687_v44  ;;  %s1728_s30 = sadd.s32 %s1211_s29, %s1837_s21  ;;  %v945_v44 = vrot.slane %v1670_v17, 3 }
  0x41   : > { %v398_v28 = vsub.f32 %v1670_v17, %v1677_v23  ;;  %s1212_s11 = sshll.u32 %s1728_s30, 3  ;;  %s1214_s21 = sshll.u32 %s1728_s30, 2 }
  0x42   : > { %1362 = vset.pattern.permute.xlu1 %v1488_v3  ;;  %v467_v3 = vld [vmem:[%s314_s17] sm:$0xff]  ;;  %s322_s14 = scalar_lea.vmem %s1809_s4, %s1212_s11  ;;  %vm1742_vm10 = vcmp.lt.f32.partialorder %v336_v48, 256.0 }
  0x43   : > { %355 = vperm.xlu1 %1362, %v338_v2   ;;  %v400_v35 = vrot.slane %v398_v28, 1 }
  0x45   : > { %v402_v38 = vmul.f32 %v400_v35, %v398_v28  ;;  %v927_v35 = vld [vmem:[%s322_s14] sm:$0xff] }
  0x47   : > { %1364 = vset.pattern.permute.xlu1 %v1489_v4  ;;  %v411_v43 = vrot.slane %v402_v38, %v351_v18 }
  0x48   : > { %375 = vperm.xlu1 %1364, %v338_v2  }
  0x4c   : > { %1365 = vset.pattern.permute.xlu1 %v1485_v0 }
  0xb0   : > { %v387_v5 = vpop.permute.xlu0 %386 }
  0xb1   : > { %v389_v6 = vsub.f32 %v338_v2, %v387_v5 }
  0xb3   : > { %391 = vrot.lane.b32.xlu0 %v389_v6, %s1490_s7 }
  0xb7   : > { %366 = vperm.xlu0 %1363, %v338_v2  }
  0xbb   : > { %1366 = vset.pattern.permute.xlu0 %v1491_v7  ;;  %v1699_v7 = vcvt.s32.f32 %v1665_v16 }
  0xbc   : > { %437 = vperm.xlu0 %1366, %v338_v2  }
  0xbd   : > { %v347_v15 = vpop.permute.xlu1 %346 }
  0xbe   : > { %v353_v31 = vmin.f32 %v347_v15, %v352_v24 }
  0xc0   : > { %1369 = vset.pattern.permute.xlu0 %v1492_v8 }
  0xc2   : > { %v356_v19 = vpop.permute.xlu1 %355 }
  0xc3   : > { %v362_v32 = vmax.f32 %v356_v19, %v361_v25 }
  0xc5   : > { %v363_v36 = vsub.f32 %v353_v31, %v362_v32 }
  0xc7   : > { %v376_v29 = vpop.permute.xlu1 %375  ;;  %v364_v41 = vmax.f32 %v363_v36, 0.0  ;;  %v1015_v36 = vrot.slane %v927_v35, 4 }
  0xc8   : > { %v382_v33 = vmax.f32 %v376_v29, %v381_v26 }
 0x125   : > { %v392_v9 = vpop.permute.xlu0 %391 }
 0x126   : > { %v394_v10 = vmul.f32 %v392_v9, %v389_v6  ;;  %v470_v6 = vsel %vm468_vm6, %v467_v3, 0 }
 0x127   : > { %v541_v9 = vand.u32 4294901760, %v470_v6 }
 0x128   : > { %405 = vperm.xlu1 %1365, %v394_v10  }
 0x129   : > { %v542_v15 = vsub.f32 %v470_v6, %v541_v9 }
 0x12b   : > { %v543_v21 = vand.u32 4294901760, %v542_v15 }
 0x12c   : > { %1367 = vset.pattern.permute.xlu1 %v1493_v12 }
 0x12d   : > { %444 = vperm.xlu1 %1367, %v442_v11   ;;  %v544_v25 = vsub.f32 %v542_v15, %v543_v21 }
 0x12f   : > { %v545_v28 = vand.u32 4294901760, %v544_v25 }
 0x131   : > { %1368 = vset.pattern.permute.xlu1 %v1492_v8 }
 0x132   : > { %449 = vperm.xlu1 %1368, %v338_v2  }
 0x136   : > { %v367_v30 = vpop.permute.xlu0 %366 }
 0x137   : > { %v373_v34 = vmin.f32 %v367_v30, %v372_v27 }
 0x139   : > { %v383_v37 = vsub.f32 %v373_v34, %v382_v33 }
 0x13b   : > { %v384_v42 = vmax.f32 %v383_v37, 0.0  ;;  %v438_v49 = vpop.permute.xlu0 %437  ;;  %v1016_v37 = vmax.f32 %v927_v35, %v1015_v36 }
 0x13c   : > { %vm440_vm2 = vcmp.eq.f32.partialorder %v336_v48, %v438_v49 }
 0x13d   : > { %v385_v46 = vmul.f32 %v384_v42, %v364_v41  ;;  %v1017_v38 = vrot.slane %v1016_v37, 2 }
 0x13f   : > { %v1018_v39 = vmax.f32 %v1016_v37, %v1017_v38 }
 0x141   : > { %v1019_v40 = vrot.slane %v1018_v39, 1 }
 0x143   : > { %v1734_v41 = vmax.f32 %v1018_v39, %v1019_v40 }
 0x145   : > { %v1021_v42 = vsub.f32 %v927_v35, %v1734_v41 }
 0x1a7   : > { %v406_v45 = vpop.permute.xlu1 %405 }
 0x1a8   : > { %v412_v47 = vadd.f32 %v411_v43, %v406_v45  ;;  %v1022_v43 = vmul.f32 1.442695, %v1021_v42 }
 0x1aa   : > { %v413_v50 = vsub.f32 %v412_v47, %v385_v46 }
 0x1ac   : > { %1370 = vrcp.f32 %v413_v50  ;;  %v445_v51 = vpop.permute.xlu1 %444  ;;  %v942_v50 = vrot.slane %v1670_v17, 7 }
 0x1ad   : > { %vm446_vm3 = vcmp.eq.s32.totalorder %v445_v51, 1  ;;  %1372 = vpow2.f32 %v1022_v43 }
 0x1ae   : > { %vm447_vm4 = vmand %vm440_vm2, %vm446_vm3  ;;  %1374 = vrcp.f32 %v1677_v23  ;;  %vm1057_vm2 = vcmask 1040384  }
 0x1af   : > { %1376 = vrcp.f32 %v942_v50 }
 0x1b1   : > { %v450_v52 = vpop.permute.xlu1 %449 }
 0x1b2   : > { %v452_v53 = vsel %vm447_vm4, %v450_v52, -1.0  ;;  %v949_v52 = vrot.slane %v1670_v17, 5 }
 0x1b3   : > { %v453_v54 = vsel %vm419_vm5, %v452_v53, -inf }
 0x1b4   : > { %v454_v55 = vrot.slane %v453_v54, 4  ;;  %1378 = vrcp.f32 %v949_v52 }
 0x1b6   : > { %v1371_v56 = vpop.eup %1370  ;;  %v455_v57 = vmax.f32 %v453_v54, %v454_v55 }
 0x1b7   : > { %v415_v58 = vmul.f32 %v1371_v56, %v385_v46  ;;  %v1373_v45 = vpop.eup %1372 }
 0x1b8   : > { %v456_v59 = vrot.slane %v455_v57, 2  ;;  %v1024_v46 = vrot.slane %v1373_v45, 4  ;;  %v1375_v48 = vpop.eup %1374 }
 0x1b9   : > { %v420_v60 = vsel %vm419_vm5, %v415_v58, -inf }
 0x1ba   : > { %v421_v61 = vrot.slane %v420_v60, 4  ;;  %v457_v62 = vmax.f32 %v455_v57, %v456_v59  ;;  %v1025_v47 = vadd.f32 %v1373_v45, %v1024_v46 }
 0x1bc   : > { %v422_v63 = vmax.f32 %v420_v60, %v421_v61  ;;  %v458_v0 = vrot.slane %v457_v62, 1  ;;  %v1026_v49 = vrot.slane %v1025_v47, 2 }
 0x1be   : > { %v423_v1 = vrot.slane %v422_v63, 2  ;;  %v459_v2 = vmax.f32 %v457_v62, %v458_v0  ;;  %v1027_v51 = vadd.f32 %v1026_v49, %v1025_v47 }
 0x1c0   : > { %v424_v4 = vmax.f32 %v422_v63, %v423_v1  ;;  %vm460_vm7 = vcmp.ge.f32.partialorder %v459_v2, 0.0  ;;  %v1028_v53 = vrot.slane %v1027_v51, 1 }
 0x1c2   : > { %v425_v5 = vrot.slane %v424_v4, 1 }
 0x1c4   : > { %v426_v8 = vmax.f32 %v424_v4, %v425_v5  ;;  %v1377_v5 = vpop.eup %1376 }
 0x1c6   : > { %vm427_vm8 = vcmp.eq.f32.partialorder %v415_v58, %v426_v8  ;;  %v1702_v10 = vsel %vm460_vm7, 1.0, %v426_v8  ;;  %v1029_v58 = vadd.f32 %v1028_v53, %v1027_v51 }
 0x1c7   : > { %v428_v11 = vsel %vm427_vm8, %v1699_v7, 3.0  ;;  %vm463_vm11 = vcmp.ge.f32.partialorder %v1702_v10, 0.5 }
 0x1c8   : > { %v429_v12 = vsel %vm419_vm5, %v428_v11, inf  ;;  %1380 = vlog2.f32 %v1029_v58  ;;  %v1379_v11 = vpop.eup %1378 }
 0x1c9   : > { %v430_v14 = vrot.slane %v429_v12, 4 }
 0x1cb   : > { %v431_v18 = vmin.f32 %v429_v12, %v430_v14 }
 0x1cd   : > { %v432_v19 = vrot.slane %v431_v18, 2 }
 0x1cf   : > { %v433_v22 = vmin.f32 %v431_v18, %v432_v19 }
 0x1d1   : > { %v434_v24 = vrot.slane %v433_v22, 1 }
 0x1d3   : > { %v435_v26 = vmin.f32 %v433_v22, %v434_v24  ;;  %v1381_v24 = vpop.eup %1380 }
 0x1d5   : > { %v461_v27 = vsel %vm460_vm7, %v459_v2, %v435_v26 }
 0x1d6   : > { %vm464_vm9 = vcmp.eq.f32.partialorder %v1699_v7, %v461_v27  ;;  %v1031_v27 = vmul.f32 0.6931472, %v1381_v24 }
 0x1d7   : > { %v1217_v29 = vsel %vm464_vm9, 1.0, %v1494_v13 }
 0x1d8   : > { %v473_v30 = vsel %vm419_vm5, %v1217_v29, 0  ;;  %1241 = vmatpush3.msk.msra.mxu1 %vm419_vm5, %v1217_v29  ;;  %1256 = vmatpush3.msk.msra.mxu0 %vm419_vm5, %v1217_v29  ;;  %v1032_v37 = vadd.f32 %v1031_v27, %v1734_v41 }
 0x1d9   : > { %v553_v31 = vsub.f32 %v473_v30, %v473_v30  ;;  %1258 = vmatmul.mubr.f32.vlgmr.msra.gmra.mrb[0].mxu0 %v543_v21  ;;  %1243 = vmatmul.mubr.f32.vlgmr.msra.gmra.mrb[0].mxu1 %v545_v28  ;;  %v926_v21 = vld [vmem:[%s261_s6] sm:$0xf]  ;;  %s330_s6 = scalar_lea.vmem %s1810_s5, %s1214_s21 }
 0x1da   : > { %1260 = vmatprep.subr.mxu0 %v1494_v13  ;;  %1245 = vmatprep.subr.mxu1 %v1494_v13 }
 0x1db   : > { %v554_v32 = vand.u32 4294901760, %v553_v31  ;;  %1262 = vmatprep.mubr.msk.f32.mxu0 %vm1495_vm1, %v1494_v13  ;;  %1247 = vmatprep.mubr.msk.f32.mxu1 %vm1495_vm1, %v1494_v13 }
 0x1dd   : > { %1261 = vmatpush3.msra.mxu0 %v554_v32  ;;  %v555_v33 = vsub.f32 %v553_v31, %v554_v32 }
 0x1de   : > { %1265 = vmatprep.subr.mxu0 %v1494_v13 }
 0x1df   : > { %v556_v34 = vand.u32 4294901760, %v555_v33 }
 0x1e1   : > { %1246 = vmatpush3.msra.mxu1 %v556_v34  ;;  %1263 = vmatmul.mubr.f32.vlgmr.msra.gmra.mrb[0].mxu0 %v541_v9 }
 0x1e2   : > { %1266 = vmatpush3.msk.msra.mxu0 %vm419_vm5, %v1217_v29  ;;  %1248 = vmatmul.mubr.f32.vlgmr.msra.gmra.mrb[0].mxu1 %v541_v9  ;;  %vm1059_vm5 = vcmask 1041408  }
 0x1e3   : > { %1250 = vmatprep.subr.mxu1 %v1494_v13  ;;  %1267 = vmatprep.mubr.msk.f32.mxu0 %vm1495_vm1, %v1494_v13 }
 0x1e4   : > { %1251 = vmatpush3.msra.mxu1 %v553_v31  ;;  %1252 = vmatprep.mubr.msk.f32.mxu1 %vm1495_vm1, %v1494_v13 }
 0x1e9   : > { %1268 = vmatmul.mubr.f32.vlgmr.msra.gmra.mrb[0].mxu0 %v541_v9 }
 0x1ea   : > { %1253 = vmatmul.mubr.f32.vlgmr.msra.gmra.mrb[0].mxu1 %v542_v15 }
 0x2bc   : > { %v917_v54 = vpop.f32.mrb[0].mxu0 }
 0x2bd   : > { %v697_v55 = vpop.f32.mrb[0].mxu1  ;;  %v1269_v56 = vpop.f32.mrb[1].mxu0 }
 0x2be   : > { %v1270_v57 = vadd.f32 %v917_v54, %v697_v55  ;;  %v1254_v59 = vpop.f32.mrb[1].mxu1 }
 0x2c0   : > { %v921_v61 = vsel %vm463_vm11, %v1270_v57, 0.0  ;;  %v929_v62 = vrot.slane %v1270_v57, 2  ;;  %v933_v63 = vrot.slane %v1270_v57, 6 }
 0x2c1   : > { %vm922_vm12 = vcmp.gt.f32.partialorder %v921_v61, 0.5  ;;  %v1036_v0 = vrot.slane %v921_v61, %v360_v20 }
 0x2c2   : > { %vm923_vm13 = vmand %vm922_vm12, %vm1742_vm10  ;;  %v931_v1 = vadd.f32 %v1270_v57, %v929_v62  ;;  %v935_v2 = vsub.f32 %v1270_v57, %v933_v63 }
 0x2c3   : > { %v1753_v3 = vsel %vm923_vm13, 1.0, %v1494_v13  ;;  %v1037_v4 = vsub.f32 %v1699_v7, %v1036_v0 }
 0x2c4   : > { %vm925_vm14 = vcmp.gt.f32.partialorder %v1753_v3, 0.5  ;;  %v932_v6 = vmul.f32 0.5, %v931_v1  ;;  %v937_v16 = vrot.slane %v935_v2, 3  ;;  %v940_v20 = vrot.slane %v935_v2, 4 }
 0x2c5   : > { %v1038_v8 = vand.u32 2147483647, %v1037_v4  ;;  %v1052_v57 = vrot.slane %v1753_v3, 7 }
 0x2c6   : > { %v939_v9 = vsel %vm925_vm14, %v937_v16, %v1677_v23  ;;  %v944_v17 = vsel %vm925_vm14, %v940_v20, %v942_v50  ;;  %v947_v10 = vsub.f32 %v932_v6, %v945_v44 }
 0x2c7   : > { %v954_v12 = vmul.f32 %v1375_v48, %v939_v9  ;;  %v959_v14 = vmul.f32 %v1377_v5, %v944_v17  ;;  %vm1039_vm15 = vcmp.lt.f32.partialorder %v1038_v8, 0.5 }
 0x2c8   : > { %v948_v7 = vmul.f32 10.0, %v947_v10  ;;  %v1225_v15 = vsel %vm1039_vm15, 1.0, %v1494_v13 }
 0x2c9   : > { %1382 = vlog2.f32 %v954_v12  ;;  %v1042_v18 = vmul.f32 %v1225_v15, %v927_v35 }
 0x2ca   : > { %v952_v19 = vmul.f32 %v1379_v11, %v948_v7  ;;  %1384 = vlog2.f32 %v959_v14 }
 0x2cb   : > { %v1043_v22 = vrot.slane %v1042_v18, 4 }
 0x2cc   : > { %v964_v23 = vrot.slane %v952_v19, 1 }
 0x2cd   : > { %v1044_v25 = vadd.f32 %v1043_v22, %v1042_v18 }
 0x2ce   : > { %v966_v26 = vsub.f32 %v926_v21, %v964_v23 }
 0x2cf   : > { %v1045_v28 = vrot.slane %v1044_v25, 2 }
 0x2d0   : > { %v967_v29 = vsel %vm925_vm14, %v966_v26, 0.0  ;;  %v969_v30 = vrot.slane %v966_v26, 1 }
 0x2d1   : > { %v988_v31 = vand.u32 2147483647, %v967_v29  ;;  %v990_v32 = vmul.f32 0.5, %v967_v29  ;;  %v1046_v13 = vadd.f32 %v1045_v28, %v1044_v25 }
 0x2d2   : > { %v971_v33 = vsel %vm925_vm14, %v969_v30, 0.0 }
 0x2d3   : > { %v1383_v34 = vpop.eup %1382  ;;  %v991_v35 = vmul.f32 %v990_v32, %v967_v29  ;;  %v994_v36 = vand.u32 2147483647, %v971_v33  ;;  %v1221_v40 = vadd.f32 -0.5, %v988_v31  ;;  %v996_v42 = vmul.f32 0.5, %v971_v33 }
 0x2d4   : > { %v1385_v38 = vpop.eup %1384  ;;  %v956_v39 = vmul.f32 0.6931472, %v1383_v34  ;;  %v1047_v43 = vrot.slane %v1046_v13, 1  ;;  %vm989_vm0 = vcmp.lt.f32.partialorder %v988_v31, 1.0 }
 0x2d5   : > { %v961_v45 = vmul.f32 0.6931472, %v1385_v38  ;;  %vm995_vm1 = vcmp.lt.f32.partialorder %v994_v36, 1.0  ;;  %v1222_v46 = vadd.f32 -0.5, %v994_v36  ;;  %v997_v49 = vmul.f32 %v996_v42, %v971_v33 }
 0x2d6   : > { %v957_v47 = vmul.f32 5.0, %v956_v39  ;;  %v1048_v50 = vadd.f32 %v1047_v43, %v1046_v13  ;;  %v993_v53 = vsel %vm989_vm0, %v991_v35, %v1221_v40 }
 0x2d7   : > { %v962_v51 = vmul.f32 5.0, %v961_v45  ;;  %v999_v54 = vsel %vm995_vm1, %v997_v49, %v1222_v46 }
 0x2d8   : > { %v973_v52 = vrot.slane %v957_v47, 6  ;;  %v1049_v55 = vsub.f32 %v1032_v37, %v1048_v50  ;;  %v1000_v41 = vadd.f32 %v999_v54, %v993_v53 }
 0x2d9   : > { %v981_v56 = vrot.slane %v962_v51, 5 }
 0x2da   : > { %v975_v58 = vsub.f32 %v926_v21, %v973_v52  ;;  %v1050_v59 = vsel %vm1742_vm10, %v1049_v55, 0.0 }
 0x2db   : > { %v983_v61 = vsub.f32 %v926_v21, %v981_v56  ;;  %v1058_v62 = vsel %vm1057_vm2, %v1050_v59, %v1052_v57 }
 0x2dc   : > { %v977_v63 = vrot.slane %v975_v58, 2 }
 0x2dd   : > { %v985_v0 = vrot.slane %v983_v61, 3 }
 0x2de   : > { %v979_v1 = vsel %vm925_vm14, %v977_v63, 0.0 }
 0x2df   : > { %v987_v2 = vsel %vm925_vm14, %v985_v0, 0.0  ;;  %v1001_v44 = vand.u32 2147483647, %v979_v1  ;;  %v1003_v48 = vmul.f32 0.5, %v979_v1 }
 0x2e0   : > { %v1008_v4 = vand.u32 2147483647, %v987_v2  ;;  %v1010_v5 = vmul.f32 0.5, %v987_v2 }
 0x2e1   : > { %vm1002_vm3 = vcmp.lt.f32.partialorder %v1001_v44, 1.0  ;;  %v1004_v6 = vmul.f32 %v1003_v48, %v979_v1  ;;  %v1223_v16 = vadd.f32 -0.5, %v1001_v44 }
 0x2e2   : > { %vm1009_vm4 = vcmp.lt.f32.partialorder %v1008_v4, 1.0  ;;  %v1011_v60 = vmul.f32 %v1010_v5, %v987_v2  ;;  %v1224_v20 = vadd.f32 -0.5, %v1008_v4 }
 0x2e3   : > { %v1006_v8 = vsel %vm1002_vm3, %v1004_v6, %v1223_v16 }
 0x2e4   : > { %v1007_v9 = vadd.f32 %v1006_v8, %v1000_v41  ;;  %v1013_v17 = vsel %vm1009_vm4, %v1011_v60, %v1224_v20 }
 0x2e6   : > { %v1014_v10 = vadd.f32 %v1013_v17, %v1007_v9 }
 0x2e8   : > { %v1055_v3 = vrot.slane %v1014_v10, 6 }
 0x2ea   : > { %v1060_v11 = vsel %vm1059_vm5, %v1058_v62, %v1055_v3 }
 0x2eb   : > { %1061 = vst [vmem:[%s330_s6] sm:$0x7] %v1060_v11 }
 0x2ec PF: > { %s18_s25 = sadd.s32 1, %s1482_s25   ;;  %s1820_s10 = sld [smem:[#allocation5_spill]] }
 0x2ed   : > { %p15_p11 = scmp.ge.s32.totalorder %s18_s25, 6   ;;  %s1821_s18 = smov %s1458_s19 }
 0x2ee   : > { %s1822_s19 = smov %s1462_s20  ;;  %s1823_s20 = smov %s1593_s13 }
 0x2ef   : > { %s1824_s21 = smov %s1474_s23  ;;  %s1825_s22 = smov %s1478_s24 }
 0x2f0   : > { %s1827_s24 = smov %s1833_s28  ;;  %17 = sbr.rel (!%p15_p11) target bundleno = 5 (0x5), region = 90 }
 0x2f2   : > { %s1826_s23 = smov %s1820_s10 }
 0x2f7   :  { %1089 = vsyncpa [#allocation3], 1 }
 0x2f8   :  { %1091 = vsyncpa [#allocation3 + $0x1], 1 }

</bundles_post_ra>
